<compile_context>
chip_gen: v7x
topology: tpu7x:2x2x1
jax: 0.10.0
libtpu: 0.0.40
codegen_flags: <defaults>
</compile_context>

<pallas_src>
import jax
import jax.numpy as jnp
from jax.experimental import pallas as pl
from jax.experimental.pallas import tpu as pltpu


LEAKY_SLOPE = 0.2  # matches nn.LeakyReLU(0.2) in the PyTorch module


# ----------------------------------------------------------------------------
# Kernel
# ----------------------------------------------------------------------------
def autoencoder_kernel(x_ref,
                       w1, b1, w2, b2, w3, b3,   # encoder (grouped weights)
                       w4, b4, w5, b5, w6, b6,   # decoder (grouped weights)
                       o_ref):
    x = x_ref[...]  # (TB/G, G*input_size) f32

    def layer(h_f32, w_ref, b_ref, act):
        # bf16 operands on the MXU, f32 accumulation.
        y = jnp.dot(h_f32.astype(jnp.bfloat16), w_ref[...],
                    preferred_element_type=jnp.float32)
        y = y + b_ref[...]                       # bias add in f32
        if act:                                  # LeakyReLU in f32 (VPU)
            y = jnp.where(y > 0, y, LEAKY_SLOPE * y)
        return y

    # Encoder
    h = layer(x, w1, b1, True)
    h = layer(h, w2, b2, True)
    z = layer(h, w3, b3, False)
    # Decoder
    h = layer(z, w4, b4, True)
    h = layer(h, w5, b5, True)
    y = layer(h, w6, b6, False)

    o_ref[...] = y.astype(o_ref.dtype)           # lane-dense (.., 128) store


# ----------------------------------------------------------------------------
# Wrapper
# ----------------------------------------------------------------------------
def _round_up(x, m):
    return ((x + m - 1) // m) * m


def _group_factor(input_size, output_size):
    """Smallest G s.t. G*in and G*out are lane-dense (multiples of 128)."""
    for g in (1, 2, 4, 8, 16):
        if (g * input_size) % 128 == 0 and (g * output_size) % 128 == 0:
            return g
    return 1  # fallback: correct, but masked (non-lane-dense) I/O


def _batch_tile(batch, g):
    unit = 8 * g                      # keep the sublane dim a multiple of 8
    tb = 256 if batch >= 256 else _round_up(batch, unit)
    return _round_up(tb, unit)


def autoencoder_forward(x, params):
    """x: (B, input_size) f32. params: [w1,b1,...,w6,b6] with w_i (in,out), b_i (1,out)."""
    w1, b1, w2, b2, w3, b3, w4, b4, w5, b5, w6, b6 = params
    input_size = w1.shape[0]
    output_size = w6.shape[1]
    B = x.shape[0]

    G = _group_factor(input_size, output_size)
    TB = _batch_tile(B, G)
    B_pad = _round_up(B, TB)
    if B_pad != B:
        x = jnp.pad(x, ((0, B_pad - B), (0, 0)))

    # Lane-dense grouped layout: pack G consecutive samples per row
    # (free, batch-major reshape in the wrapper).
    rows = B_pad // G
    x_dense = x.reshape(rows, G * input_size)

    # Block-diagonal weights / tiled biases so every layer maps the grouped
    # layout to the grouped layout (built once, tiny, kept VMEM-resident).
    def wblk(w):
        return jnp.kron(jnp.eye(G, dtype=w.dtype), w).astype(jnp.bfloat16)

    def bblk(b):
        return jnp.tile(b, (1, G)).astype(jnp.float32)

    gparams = []
    for w, b in ((w1, b1), (w2, b2), (w3, b3), (w4, b4), (w5, b5), (w6, b6)):
        gparams += [wblk(w), bblk(b)]

    TBG = TB // G
    grid = (rows // TBG,)

    x_spec = pl.BlockSpec((TBG, G * input_size), lambda i: (i, 0))
    out_spec = pl.BlockSpec((TBG, G * output_size), lambda i: (i, 0))
    # Full-array blocks with constant index_map -> weights stay resident,
    # no re-DMA across grid steps.
    resident = lambda a: pl.BlockSpec(a.shape, lambda i: (0, 0))
    in_specs = [x_spec] + [resident(a) for a in gparams]

    y_dense = pl.pallas_call(
        autoencoder_kernel,
        out_shape=jax.ShapeDtypeStruct((rows, G * output_size), jnp.float32),
        grid=grid,
        in_specs=in_specs,
        out_specs=out_spec,
        compiler_params=pltpu.CompilerParams(
            dimension_semantics=("parallel",)),   # v7x: shard batch over 2 TCs
    )(x_dense, *gparams)

    return y_dense.reshape(B_pad, output_size)[:B]


# ----------------------------------------------------------------------------
# Params / reference
# ----------------------------------------------------------------------------
def init_params(key, input_size, latent_size, output_size):
    """Deterministic init. Weights (in, out); biases 2D as (1, out)."""
    dims = [
        (input_size, 128),   # encoder L1
        (128, 64),           # encoder L2
        (64, latent_size),   # encoder L3
        (latent_size, 64),   # decoder L1
        (64, 128),           # decoder L2
        (128, output_size),  # decoder L3
    ]
    params = []
    for (fan_in, fan_out) in dims:
        key, kw, kb = jax.random.split(key, 3)
        bound = 1.0 / (fan_in ** 0.5)  # PyTorch nn.Linear default range
        w = jax.random.uniform(kw, (fan_in, fan_out), jnp.float32, -bound, bound)
        b = jax.random.uniform(kb, (1, fan_out), jnp.float32, -bound, bound)
        params += [w, b]
    return params


def reference_forward(x, params):
    w1, b1, w2, b2, w3, b3, w4, b4, w5, b5, w6, b6 = params
    lr = lambda v: jnp.where(v > 0, v, LEAKY_SLOPE * v)
    h = lr(x @ w1 + b1)
    h = lr(h @ w2 + b2)
    z = h @ w3 + b3
    h = lr(z @ w4 + b4)
    h = lr(h @ w5 + b5)
    return h @ w6 + b6


if __name__ == "__main__":
    input_size = 32
    latent_size = 8
    output_size = 32
    batch = 8

    key = jax.random.PRNGKey(0)
    key, kx = jax.random.split(key)
    x = jax.random.normal(kx, (batch, input_size), jnp.float32)

    params = init_params(key, input_size, latent_size, output_size)

    out = jax.block_until_ready(autoencoder_forward(x, params))

    ref = reference_forward(x, params)
    assert out.shape == (batch, output_size)
    # bf16 matmul operands (f32 accumulation) -> loosened tolerance vs f32 ref.
    assert jnp.allclose(out, ref, atol=5e-2, rtol=5e-2), "mismatch vs reference"

    print("KERNEL_OK")
</pallas_src>

<mosaic_0001>
module attributes {stable_mosaic.version = 11 : i64} {
  func.func @autoencoder_kernel(%arg0: i32, %arg1: memref<8x128xf32, #tpu.memory_space<vmem>>, %arg2: memref<128x512xbf16, #tpu.memory_space<vmem>>, %arg3: memref<1x512xf32, #tpu.memory_space<vmem>>, %arg4: memref<512x256xbf16, #tpu.memory_space<vmem>>, %arg5: memref<1x256xf32, #tpu.memory_space<vmem>>, %arg6: memref<256x32xbf16, #tpu.memory_space<vmem>>, %arg7: memref<1x32xf32, #tpu.memory_space<vmem>>, %arg8: memref<32x256xbf16, #tpu.memory_space<vmem>>, %arg9: memref<1x256xf32, #tpu.memory_space<vmem>>, %arg10: memref<256x512xbf16, #tpu.memory_space<vmem>>, %arg11: memref<1x512xf32, #tpu.memory_space<vmem>>, %arg12: memref<512x128xbf16, #tpu.memory_space<vmem>>, %arg13: memref<1x128xf32, #tpu.memory_space<vmem>>, %arg14: memref<8x128xf32, #tpu.memory_space<vmem>>) attributes {dimension_semantics = [#tpu.dimension_semantics<parallel>], iteration_bounds = array<i64: 1>, scalar_prefetch = 0 : i64, scratch_operands = 0 : i64, tpu.core_type = #tpu.core_type<tc>, window_params = [{transform_indices = @transform_0, window_bounds = array<i64: 8, 128>}, {pipeline_mode = #tpu.pipeline_mode<synchronous>, transform_indices = @transform_1, window_bounds = array<i64: 128, 512>}, {pipeline_mode = #tpu.pipeline_mode<synchronous>, transform_indices = @transform_2, window_bounds = array<i64: 1, 512>}, {pipeline_mode = #tpu.pipeline_mode<synchronous>, transform_indices = @transform_3, window_bounds = array<i64: 512, 256>}, {pipeline_mode = #tpu.pipeline_mode<synchronous>, transform_indices = @transform_4, window_bounds = array<i64: 1, 256>}, {pipeline_mode = #tpu.pipeline_mode<synchronous>, transform_indices = @transform_5, window_bounds = array<i64: 256, 32>}, {pipeline_mode = #tpu.pipeline_mode<synchronous>, transform_indices = @transform_6, window_bounds = array<i64: 1, 32>}, {pipeline_mode = #tpu.pipeline_mode<synchronous>, transform_indices = @transform_7, window_bounds = array<i64: 32, 256>}, {pipeline_mode = #tpu.pipeline_mode<synchronous>, transform_indices = @transform_8, window_bounds = array<i64: 1, 256>}, {pipeline_mode = #tpu.pipeline_mode<synchronous>, transform_indices = @transform_9, window_bounds = array<i64: 256, 512>}, {pipeline_mode = #tpu.pipeline_mode<synchronous>, transform_indices = @transform_10, window_bounds = array<i64: 1, 512>}, {pipeline_mode = #tpu.pipeline_mode<synchronous>, transform_indices = @transform_11, window_bounds = array<i64: 512, 128>}, {pipeline_mode = #tpu.pipeline_mode<synchronous>, transform_indices = @transform_12, window_bounds = array<i64: 1, 128>}, {transform_indices = @transform_13, window_bounds = array<i64: 8, 128>}]} {
    %c0 = arith.constant 0 : index
    %c0_0 = arith.constant 0 : index
    %0 = vector.load %arg1[%c0, %c0_0] : memref<8x128xf32, #tpu.memory_space<vmem>>, vector<8x128xf32>
    %1 = arith.truncf %0 : vector<8x128xf32> to vector<8x128xbf16>
    %c0_1 = arith.constant 0 : index
    %c0_2 = arith.constant 0 : index
    %2 = vector.load %arg2[%c0_1, %c0_2] : memref<128x512xbf16, #tpu.memory_space<vmem>>, vector<128x512xbf16>
    %cst = arith.constant dense<0.000000e+00> : vector<8x512xf32>
    %3 = tpu.matmul %1, %2, %cst {dimension_numbers = #tpu.dot_dimension_numbers<[1], [0], [0], [1], [0, 0, 1, 1], [], []>} : vector<8x128xbf16>, vector<128x512xbf16>, vector<8x512xf32> -> vector<8x512xf32>
    %c0_3 = arith.constant 0 : index
    %c0_4 = arith.constant 0 : index
    %4 = vector.load %arg3[%c0_3, %c0_4] : memref<1x512xf32, #tpu.memory_space<vmem>>, vector<1x512xf32>
    %5 = vector.broadcast %4 : vector<1x512xf32> to vector<8x512xf32>
    %6 = arith.addf %3, %5 : vector<8x512xf32>
    %cst_5 = arith.constant 0.000000e+00 : f32
    %7 = vector.broadcast %cst_5 : f32 to vector<8x512xf32>
    %8 = arith.cmpf ogt, %6, %7 : vector<8x512xf32>
    %cst_6 = arith.constant 2.000000e-01 : f32
    %9 = vector.broadcast %cst_6 : f32 to vector<8x512xf32>
    %10 = arith.mulf %9, %6 : vector<8x512xf32>
    %11 = arith.select %8, %6, %10 : vector<8x512xi1>, vector<8x512xf32>
    %12 = arith.truncf %11 : vector<8x512xf32> to vector<8x512xbf16>
    %c0_7 = arith.constant 0 : index
    %c0_8 = arith.constant 0 : index
    %13 = vector.load %arg4[%c0_7, %c0_8] : memref<512x256xbf16, #tpu.memory_space<vmem>>, vector<512x256xbf16>
    %cst_9 = arith.constant dense<0.000000e+00> : vector<8x256xf32>
    %14 = tpu.matmul %12, %13, %cst_9 {dimension_numbers = #tpu.dot_dimension_numbers<[1], [0], [0], [1], [0, 0, 1, 1], [], []>} : vector<8x512xbf16>, vector<512x256xbf16>, vector<8x256xf32> -> vector<8x256xf32>
    %c0_10 = arith.constant 0 : index
    %c0_11 = arith.constant 0 : index
    %15 = vector.load %arg5[%c0_10, %c0_11] : memref<1x256xf32, #tpu.memory_space<vmem>>, vector<1x256xf32>
    %16 = vector.broadcast %15 : vector<1x256xf32> to vector<8x256xf32>
    %17 = arith.addf %14, %16 : vector<8x256xf32>
    %cst_12 = arith.constant 0.000000e+00 : f32
    %18 = vector.broadcast %cst_12 : f32 to vector<8x256xf32>
    %19 = arith.cmpf ogt, %17, %18 : vector<8x256xf32>
    %cst_13 = arith.constant 2.000000e-01 : f32
    %20 = vector.broadcast %cst_13 : f32 to vector<8x256xf32>
    %21 = arith.mulf %20, %17 : vector<8x256xf32>
    %22 = arith.select %19, %17, %21 : vector<8x256xi1>, vector<8x256xf32>
    %23 = arith.truncf %22 : vector<8x256xf32> to vector<8x256xbf16>
    %c0_14 = arith.constant 0 : index
    %c0_15 = arith.constant 0 : index
    %24 = vector.load %arg6[%c0_14, %c0_15] : memref<256x32xbf16, #tpu.memory_space<vmem>>, vector<256x32xbf16>
    %cst_16 = arith.constant dense<0.000000e+00> : vector<8x32xf32>
    %25 = tpu.matmul %23, %24, %cst_16 {dimension_numbers = #tpu.dot_dimension_numbers<[1], [0], [0], [1], [0, 0, 1, 1], [], []>} : vector<8x256xbf16>, vector<256x32xbf16>, vector<8x32xf32> -> vector<8x32xf32>
    %c0_17 = arith.constant 0 : index
    %c0_18 = arith.constant 0 : index
    %26 = vector.load %arg7[%c0_17, %c0_18] : memref<1x32xf32, #tpu.memory_space<vmem>>, vector<1x32xf32>
    %27 = vector.broadcast %26 : vector<1x32xf32> to vector<8x32xf32>
    %28 = arith.addf %25, %27 : vector<8x32xf32>
    %29 = arith.truncf %28 : vector<8x32xf32> to vector<8x32xbf16>
    %c0_19 = arith.constant 0 : index
    %c0_20 = arith.constant 0 : index
    %30 = vector.load %arg8[%c0_19, %c0_20] : memref<32x256xbf16, #tpu.memory_space<vmem>>, vector<32x256xbf16>
    %cst_21 = arith.constant dense<0.000000e+00> : vector<8x256xf32>
    %31 = tpu.matmul %29, %30, %cst_21 {dimension_numbers = #tpu.dot_dimension_numbers<[1], [0], [0], [1], [0, 0, 1, 1], [], []>} : vector<8x32xbf16>, vector<32x256xbf16>, vector<8x256xf32> -> vector<8x256xf32>
    %c0_22 = arith.constant 0 : index
    %c0_23 = arith.constant 0 : index
    %32 = vector.load %arg9[%c0_22, %c0_23] : memref<1x256xf32, #tpu.memory_space<vmem>>, vector<1x256xf32>
    %33 = vector.broadcast %32 : vector<1x256xf32> to vector<8x256xf32>
    %34 = arith.addf %31, %33 : vector<8x256xf32>
    %cst_24 = arith.constant 0.000000e+00 : f32
    %35 = vector.broadcast %cst_24 : f32 to vector<8x256xf32>
    %36 = arith.cmpf ogt, %34, %35 : vector<8x256xf32>
    %cst_25 = arith.constant 2.000000e-01 : f32
    %37 = vector.broadcast %cst_25 : f32 to vector<8x256xf32>
    %38 = arith.mulf %37, %34 : vector<8x256xf32>
    %39 = arith.select %36, %34, %38 : vector<8x256xi1>, vector<8x256xf32>
    %40 = arith.truncf %39 : vector<8x256xf32> to vector<8x256xbf16>
    %c0_26 = arith.constant 0 : index
    %c0_27 = arith.constant 0 : index
    %41 = vector.load %arg10[%c0_26, %c0_27] : memref<256x512xbf16, #tpu.memory_space<vmem>>, vector<256x512xbf16>
    %cst_28 = arith.constant dense<0.000000e+00> : vector<8x512xf32>
    %42 = tpu.matmul %40, %41, %cst_28 {dimension_numbers = #tpu.dot_dimension_numbers<[1], [0], [0], [1], [0, 0, 1, 1], [], []>} : vector<8x256xbf16>, vector<256x512xbf16>, vector<8x512xf32> -> vector<8x512xf32>
    %c0_29 = arith.constant 0 : index
    %c0_30 = arith.constant 0 : index
    %43 = vector.load %arg11[%c0_29, %c0_30] : memref<1x512xf32, #tpu.memory_space<vmem>>, vector<1x512xf32>
    %44 = vector.broadcast %43 : vector<1x512xf32> to vector<8x512xf32>
    %45 = arith.addf %42, %44 : vector<8x512xf32>
    %cst_31 = arith.constant 0.000000e+00 : f32
    %46 = vector.broadcast %cst_31 : f32 to vector<8x512xf32>
    %47 = arith.cmpf ogt, %45, %46 : vector<8x512xf32>
    %cst_32 = arith.constant 2.000000e-01 : f32
    %48 = vector.broadcast %cst_32 : f32 to vector<8x512xf32>
    %49 = arith.mulf %48, %45 : vector<8x512xf32>
    %50 = arith.select %47, %45, %49 : vector<8x512xi1>, vector<8x512xf32>
    %51 = arith.truncf %50 : vector<8x512xf32> to vector<8x512xbf16>
    %c0_33 = arith.constant 0 : index
    %c0_34 = arith.constant 0 : index
    %52 = vector.load %arg12[%c0_33, %c0_34] : memref<512x128xbf16, #tpu.memory_space<vmem>>, vector<512x128xbf16>
    %cst_35 = arith.constant dense<0.000000e+00> : vector<8x128xf32>
    %53 = tpu.matmul %51, %52, %cst_35 {dimension_numbers = #tpu.dot_dimension_numbers<[1], [0], [0], [1], [0, 0, 1, 1], [], []>} : vector<8x512xbf16>, vector<512x128xbf16>, vector<8x128xf32> -> vector<8x128xf32>
    %c0_36 = arith.constant 0 : index
    %c0_37 = arith.constant 0 : index
    %54 = vector.load %arg13[%c0_36, %c0_37] : memref<1x128xf32, #tpu.memory_space<vmem>>, vector<1x128xf32>
    %55 = vector.broadcast %54 : vector<1x128xf32> to vector<8x128xf32>
    %56 = arith.addf %53, %55 : vector<8x128xf32>
    %c0_38 = arith.constant 0 : index
    %c0_39 = arith.constant 0 : index
    %57 = vector.load %arg14[%c0_38, %c0_39] : memref<8x128xf32, #tpu.memory_space<vmem>>, vector<8x128xf32>
    tpu.vector_store %arg14[%c0_38, %c0_39], %56 {strides = array<i32>} : memref<8x128xf32, #tpu.memory_space<vmem>>, vector<8x128xf32>,
    return
  }
  func.func @transform_0(%arg0: i32) -> (i32, i32) {
    %c0_i32 = arith.constant 0 : i32
    %c0_i32_0 = arith.constant 0 : i32
    return %arg0, %c0_i32 : i32, i32
  }
  func.func @transform_1(%arg0: i32) -> (i32, i32) {
    %c0_i32 = arith.constant 0 : i32
    %c0_i32_0 = arith.constant 0 : i32
    %c0_i32_1 = arith.constant 0 : i32
    return %c0_i32, %c0_i32_0 : i32, i32
  }
  func.func @transform_2(%arg0: i32) -> (i32, i32) {
    %c0_i32 = arith.constant 0 : i32
    %c0_i32_0 = arith.constant 0 : i32
    %c0_i32_1 = arith.constant 0 : i32
    return %c0_i32, %c0_i32_0 : i32, i32
  }
  func.func @transform_3(%arg0: i32) -> (i32, i32) {
    %c0_i32 = arith.constant 0 : i32
    %c0_i32_0 = arith.constant 0 : i32
    %c0_i32_1 = arith.constant 0 : i32
    return %c0_i32, %c0_i32_0 : i32, i32
  }
  func.func @transform_4(%arg0: i32) -> (i32, i32) {
    %c0_i32 = arith.constant 0 : i32
    %c0_i32_0 = arith.constant 0 : i32
    %c0_i32_1 = arith.constant 0 : i32
    return %c0_i32, %c0_i32_0 : i32, i32
  }
  func.func @transform_5(%arg0: i32) -> (i32, i32) {
    %c0_i32 = arith.constant 0 : i32
    %c0_i32_0 = arith.constant 0 : i32
    %c0_i32_1 = arith.constant 0 : i32
    return %c0_i32, %c0_i32_0 : i32, i32
  }
  func.func @transform_6(%arg0: i32) -> (i32, i32) {
    %c0_i32 = arith.constant 0 : i32
    %c0_i32_0 = arith.constant 0 : i32
    %c0_i32_1 = arith.constant 0 : i32
    return %c0_i32, %c0_i32_0 : i32, i32
  }
  func.func @transform_7(%arg0: i32) -> (i32, i32) {
    %c0_i32 = arith.constant 0 : i32
    %c0_i32_0 = arith.constant 0 : i32
    %c0_i32_1 = arith.constant 0 : i32
    return %c0_i32, %c0_i32_0 : i32, i32
  }
  func.func @transform_8(%arg0: i32) -> (i32, i32) {
    %c0_i32 = arith.constant 0 : i32
    %c0_i32_0 = arith.constant 0 : i32
    %c0_i32_1 = arith.constant 0 : i32
    return %c0_i32, %c0_i32_0 : i32, i32
  }
  func.func @transform_9(%arg0: i32) -> (i32, i32) {
    %c0_i32 = arith.constant 0 : i32
    %c0_i32_0 = arith.constant 0 : i32
    %c0_i32_1 = arith.constant 0 : i32
    return %c0_i32, %c0_i32_0 : i32, i32
  }
  func.func @transform_10(%arg0: i32) -> (i32, i32) {
    %c0_i32 = arith.constant 0 : i32
    %c0_i32_0 = arith.constant 0 : i32
    %c0_i32_1 = arith.constant 0 : i32
    return %c0_i32, %c0_i32_0 : i32, i32
  }
  func.func @transform_11(%arg0: i32) -> (i32, i32) {
    %c0_i32 = arith.constant 0 : i32
    %c0_i32_0 = arith.constant 0 : i32
    %c0_i32_1 = arith.constant 0 : i32
    return %c0_i32, %c0_i32_0 : i32, i32
  }
  func.func @transform_12(%arg0: i32) -> (i32, i32) {
    %c0_i32 = arith.constant 0 : i32
    %c0_i32_0 = arith.constant 0 : i32
    %c0_i32_1 = arith.constant 0 : i32
    return %c0_i32, %c0_i32_0 : i32, i32
  }
  func.func @transform_13(%arg0: i32) -> (i32, i32) {
    %c0_i32 = arith.constant 0 : i32
    %c0_i32_0 = arith.constant 0 : i32
    return %arg0, %c0_i32 : i32, i32
  }
}

</mosaic_0001>

<bundles_post_ra>
// kernel: tpu_custom_call.1
= control target key start
LH: loop header
LB: loop body
LE: loop exit
PB: predicated region body
PF: predicated region fallthrough
CT: control target
= control target key end

     0   :  { %18 = vsyncpa [#allocation3], 0  ;;  %s3011_s0 = inlined_call_operand.vmem [shape: f32[8,128], index: 0, kind: input, shape index: {}]   ;;  %s3012_s1 = inlined_call_operand.hbm [shape: bf16[128,512], index: 1, kind: input, shape index: {}]   ;;  %s3013_s2 = inlined_call_operand.vmem [shape: f32[1,512], index: 2, kind: input, shape index: {}]   ;;  %s3014_s3 = inlined_call_operand.hbm [shape: bf16[512,256], index: 3, kind: input, shape index: {}]   ;;  %s3015_s4 = inlined_call_operand.vmem [shape: f32[1,256], index: 4, kind: input, shape index: {}]   ;;  %s3016_s5 = inlined_call_operand.vmem [shape: bf16[256,32], index: 5, kind: input, shape index: {}]   ;;  %s3017_s6 = inlined_call_operand.vmem [shape: f32[1,32], index: 6, kind: input, shape index: {}]   ;;  %s3018_s7 = inlined_call_operand.vmem [shape: bf16[32,256], index: 7, kind: input, shape index: {}]   ;;  %s3019_s8 = inlined_call_operand.vmem [shape: f32[1,256], index: 8, kind: input, shape index: {}]   ;;  %s3020_s9 = inlined_call_operand.hbm [shape: bf16[256,512], index: 9, kind: input, shape index: {}]   ;;  %s3021_s10 = inlined_call_operand.vmem [shape: f32[1,512], index: 10, kind: input, shape index: {}]   ;;  %s3022_s11 = inlined_call_operand.hbm [shape: bf16[512,128], index: 11, kind: input, shape index: {}]   ;;  %s3023_s12 = inlined_call_operand.vmem [shape: f32[1,128], index: 12, kind: input, shape index: {}]   ;;  %s3024_s13 = inlined_call_operand.hbm [shape: f32[8,128], index: 13, kind: output, shape index: {}]  }
   0x1   :  { %19 = vsyncpa [#allocation6], 0 }
   0x2   :  { %20 = vsyncpa [#allocation9], 0 }
   0x3   :  { %21 = vsyncpa [#allocation4], 0  ;;  %s2742_s25 = smov [#allocation5]   ;;  %s2624_s29 = scalar_lea.hbm %s3014_s3, 8192 }
   0x4   :  { %s43_s26 = sshll.u32 %s2742_s25, 4  ;;  %p2625_p0 = scmp.ne.s32.totalorder %s3014_s3, %s2624_s29  ;;  %s44_s26 = int_to_ptr.vmem [resolvable:$true] %s43_s26 }
   0x5   :  { %p2628_p1 = scmp.lt.u32.totalorder %s2624_s29, %s3014_s3 }
   0x7   :  { %p2630_p2 = pnand %p2628_p1, %p2625_p0 }
   0x9   :  { %2633 = shalt.err (!%p2630_p2)
}
   0xa   :  { %s2634_s17 = scalar_lea.vmem %s44_s26, 8192  ;;  %p2639_p4 = scmp.lt.s32.totalorder %s44_s26, %s44_s26 }
   0xb   :  { %p2635_p3 = scmp.ne.s32.totalorder %s44_s26, %s2634_s17  ;;  %p2640_p5 = scmp.lt.s32.totalorder %s2634_s17, %s2634_s17 }
   0xd   :  { %p2641_p6 = por %p2640_p5, %p2639_p4 }
   0xf   :  { %p2642_p7 = pnand %p2641_p6, %p2635_p3 }
  0x11   :  { %2645 = shalt.err (!%p2642_p7)
}
  0x12   :  { %s2743_s18 = smov 128   ;;  %s2744_s19 = smov 8  }
  0x13   :  { %49 = dma.hbm_to_vmem [thread:$0]  %s3014_s3, 8192, %s44_s26, [#allocation6], %s2743_s18, %s2743_s18, %s2744_s19  }
  0x14   :  { %s2745_s22 = smov [#allocation2]   ;;  %s2646_s27 = scalar_lea.hbm %s3012_s1, 4096 }
  0x15   :  { %s29_s23 = sshll.u32 %s2745_s22, 4  ;;  %p2647_p8 = scmp.ne.s32.totalorder %s3012_s1, %s2646_s27  ;;  %s30_s23 = int_to_ptr.vmem [resolvable:$true] %s29_s23 }
  0x16   :  { %p2650_p9 = scmp.lt.u32.totalorder %s2646_s27, %s3012_s1 }
  0x18   :  { %p2652_p10 = pnand %p2650_p9, %p2647_p8 }
  0x1a   :  { %2655 = shalt.err (!%p2652_p10)
}
  0x1b   :  { %s2656_s15 = scalar_lea.vmem %s30_s23, 4096  ;;  %p2661_p12 = scmp.lt.s32.totalorder %s30_s23, %s30_s23 }
  0x1c   :  { %p2657_p11 = scmp.ne.s32.totalorder %s30_s23, %s2656_s15  ;;  %p2662_p13 = scmp.lt.s32.totalorder %s2656_s15, %s2656_s15 }
  0x1e   :  { %p2663_p0 = por %p2662_p13, %p2661_p12 }
  0x20   :  { %p2664_p1 = pnand %p2663_p0, %p2657_p11 }
  0x22   :  { %2667 = shalt.err (!%p2664_p1)
}
  0x23   :  { %s2746_s3 = smov 256   ;;  %s2747_s26 = smov 16  }
  0x24   :  { %35 = dma.hbm_to_vmem [thread:$0]  %s3012_s1, 4096, %s30_s23, [#allocation3], %s2746_s3, %s2746_s3, %s2747_s26  }
  0x25   :  { %s2748_s18 = smov [#allocation7]   ;;  %s2749_s20 = smov [#allocation8]  }
  0x26   :  { %s65_s19 = sshll.u32 %s2748_s18, 4  ;;  %s79_s21 = sshll.u32 %s2749_s20, 4  ;;  %s66_s19 = int_to_ptr.vmem [resolvable:$true] %s65_s19  ;;  %s2848_s21 = int_to_ptr.vmem [resolvable:$true] %s79_s21 }
  0x27   :  { %s2668_s25 = scalar_lea.hbm %s3020_s9, 8192 }
  0x28   :  { %p2669_p2 = scmp.ne.s32.totalorder %s3020_s9, %s2668_s25  ;;  %p2672_p3 = scmp.lt.u32.totalorder %s2668_s25, %s3020_s9 }
  0x2a   :  { %p2674_p4 = pnand %p2672_p3, %p2669_p2 }
  0x2c   :  { %2677 = shalt.err (!%p2674_p4)
}
  0x2d   :  { %s2678_s1 = scalar_lea.vmem %s66_s19, 8192  ;;  %p2683_p6 = scmp.lt.s32.totalorder %s66_s19, %s66_s19 }
  0x2e   :  { %p2679_p5 = scmp.ne.s32.totalorder %s66_s19, %s2678_s1  ;;  %p2684_p7 = scmp.lt.s32.totalorder %s2678_s1, %s2678_s1 }
  0x30   :  { %p2685_p8 = por %p2684_p7, %p2683_p6 }
  0x32   :  { %p2686_p9 = pnand %p2685_p8, %p2679_p5 }
  0x34   :  { %2689 = shalt.err (!%p2686_p9)
}
  0x35   :  { %71 = dma.hbm_to_vmem [thread:$0]  %s3020_s9, 8192, %s66_s19, [#allocation6], %s2746_s3, %s2746_s3, %s2747_s26  }
  0x36   :  { %s2690_s17 = scalar_lea.hbm %s3022_s11, 4096 }
  0x37   :  { %p2691_p10 = scmp.ne.s32.totalorder %s3022_s11, %s2690_s17  ;;  %p2694_p11 = scmp.lt.u32.totalorder %s2690_s17, %s3022_s11 }
  0x39   :  { %p2696_p12 = pnand %p2694_p11, %p2691_p10 }
  0x3b   :  { %2699 = shalt.err (!%p2696_p12)
}
  0x3c   :  { %s2700_s25 = scalar_lea.vmem %s2848_s21, 4096  ;;  %p2705_p0 = scmp.lt.s32.totalorder %s2848_s21, %s2848_s21 }
  0x3d   :  { %p2701_p13 = scmp.ne.s32.totalorder %s2848_s21, %s2700_s25  ;;  %p2706_p1 = scmp.lt.s32.totalorder %s2700_s25, %s2700_s25 }
  0x3f   :  { %p2707_p2 = por %p2706_p1, %p2705_p0 }
  0x41   :  { %p2708_p3 = pnand %p2707_p2, %p2701_p13 }
  0x43   :  { %2711 = shalt.err (!%p2708_p3)
}
  0x44   :  { %s2750_s9 = smov 64   ;;  %s2751_s3 = smov 4  }
  0x45   :  { %85 = dma.hbm_to_vmem [thread:$0]  %s3022_s11, 4096, %s2848_s21, [#allocation9], %s2750_s9, %s2750_s9, %s2751_s3  }
  0x46   :  { %2734 = dma.done.wait [#allocation3], 4096  }
  0x47   :  { %2735 = vsyncadd [#allocation3], 4294963200 }
  0x48   :  { %2736 = dma.done.wait [#allocation6], 16384  }
  0x49   :  { %2737 = vsyncadd [#allocation6], 4294950912 }
  0x4a   :  { %2738 = dma.done.wait [#allocation9], 4096  }
  0x4b   :  { %2739 = vsyncadd [#allocation9], 4294963200  ;;  %v2752_v0 = vmov 0   ;;  %v2330_v1 = vld [vmem:[#allocation2 + $0x4] ss:$16 sps:$4 sm:$0xff]   ;;  %vm1113_vm6 = vcmask 261120  }
  0x4c   :  { %349 = vmatprep.mubr.bf16.mxu0 %v2752_v0  ;;  %390 = vmatprep.mubr.bf16.mxu1 %v2752_v0  ;;  %v2332_v2 = vld [vmem:[#allocation2] ss:$16 sps:$4 sm:$0xff]   ;;  %v2333_v3 = vld [vmem:[#allocation2 + $0x24] ss:$16 sps:$4 sm:$0xff]   ;;  %v2354_v10 = vld [vmem:[#allocation2 + $0xc] ss:$16 sps:$4 sm:$0xff]  }
  0x4d   :  { %317 = vmatprep.subr.bf16.mxu0 %v2330_v1  ;;  %v2335_v4 = vld [vmem:[#allocation2 + $0x20] ss:$16 sps:$4 sm:$0xff]   ;;  %v2336_v5 = vld [vmem:[#allocation2 + $0x44] ss:$16 sps:$4 sm:$0xff]   ;;  %v2356_v11 = vld [vmem:[#allocation2 + $0x8] ss:$16 sps:$4 sm:$0xff]   ;;  %358 = vmatprep.subr.bf16.mxu1 %v2354_v10 }
  0x4e   :  { %318 = vmatpush1.bf16.msra.mxu0 %v2332_v2  ;;  %v2338_v6 = vld [vmem:[#allocation2 + $0x40] ss:$16 sps:$4 sm:$0xff]   ;;  %v2339_v7 = vld [vmem:[#allocation2 + $0x64] ss:$16 sps:$4 sm:$0xff]   ;;  %v2357_v12 = vld [vmem:[#allocation2 + $0x2c] ss:$16 sps:$4 sm:$0xff]   ;;  %359 = vmatpush1.bf16.msra.mxu1 %v2356_v11 }
  0x4f   :  { %319 = vmatprep.subr.bf16.mxu0 %v2333_v3  ;;  %v2341_v8 = vld [vmem:[#allocation2 + $0x60] ss:$16 sps:$4 sm:$0xff]   ;;  %v2342_v9 = vld [vmem:[#allocation2 + $0x84] ss:$16 sps:$4 sm:$0xff]   ;;  %v2359_v14 = vld [vmem:[#allocation2 + $0x28] ss:$16 sps:$4 sm:$0xff]   ;;  %360 = vmatprep.subr.bf16.mxu1 %v2357_v12 }
  0x50   :  { %v2344_v13 = vld [vmem:[#allocation2 + $0x80] ss:$16 sps:$4 sm:$0xff]   ;;  %v2360_v15 = vld [vmem:[#allocation2 + $0x4c] ss:$16 sps:$4 sm:$0xff]   ;;  %v2345_v16 = vld [vmem:[#allocation2 + $0xa4] ss:$16 sps:$4 sm:$0xff]  }
  0x51   :  { %v2347_v17 = vld [vmem:[#allocation2 + $0xa0] ss:$16 sps:$4 sm:$0xff]   ;;  %v2362_v18 = vld [vmem:[#allocation2 + $0x48] ss:$16 sps:$4 sm:$0xff]   ;;  %v2363_v19 = vld [vmem:[#allocation2 + $0x6c] ss:$16 sps:$4 sm:$0xff]  }
  0x52   :  { %320 = vmatpush1.bf16.msra.mxu0 %v2335_v4  ;;  %361 = vmatpush1.bf16.msra.mxu1 %v2359_v14  ;;  %v2348_v20 = vld [vmem:[#allocation2 + $0xc4] ss:$16 sps:$4 sm:$0xff]   ;;  %v2350_v21 = vld [vmem:[#allocation2 + $0xc0] ss:$16 sps:$4 sm:$0xff]   ;;  %v2365_v22 = vld [vmem:[#allocation2 + $0x68] ss:$16 sps:$4 sm:$0xff]  }
  0x53   :  { %321 = vmatprep.subr.bf16.mxu0 %v2336_v5  ;;  %362 = vmatprep.subr.bf16.mxu1 %v2360_v15  ;;  %v2366_v23 = vld [vmem:[#allocation2 + $0x8c] ss:$16 sps:$4 sm:$0xff]   ;;  %v2351_v24 = vld [vmem:[#allocation2 + $0xe4] ss:$16 sps:$4 sm:$0xff]   ;;  %v2353_v25 = vld [vmem:[#allocation2 + $0xe0] ss:$16 sps:$4 sm:$0xff]  }
  0x54   :  { %v101_v26 = vld [vmem:[%s3011_s0] sm:$0xff]  ;;  %v2368_v27 = vld [vmem:[#allocation2 + $0x88] ss:$16 sps:$4 sm:$0xff]   ;;  %v2369_v28 = vld [vmem:[#allocation2 + $0xac] ss:$16 sps:$4 sm:$0xff]   ;;  %s2753_s27 = smov [#allocation10]  }
  0x55   :  { %v2380_v29 = vld [vmem:[#allocation5 + $0x4] ss:$8 sps:$4 sm:$0xff]   ;;  %v102_v30 = vpack.c.bf16 %v101_v26, %v101_v26  ;;  %v2371_v31 = vld [vmem:[#allocation2 + $0xa8] ss:$16 sps:$4 sm:$0xff]   ;;  %v2383_v34 = vld [vmem:[#allocation5 + $0x14] ss:$8 sps:$4 sm:$0xff]  }
  0x56   :  { %322 = vmatpush1.bf16.msra.mxu0 %v2338_v6  ;;  %363 = vmatpush1.bf16.msra.mxu1 %v2362_v18  ;;  %v2372_v32 = vld [vmem:[#allocation2 + $0xcc] ss:$16 sps:$4 sm:$0xff]   ;;  %v2378_v33 = vld [vmem:[#allocation5] ss:$8 sps:$4 sm:$0xff]   ;;  %v2381_v37 = vld [vmem:[#allocation5 + $0x10] ss:$8 sps:$4 sm:$0xff]  }
  0x57   :  { %323 = vmatprep.subr.bf16.mxu0 %v2339_v7  ;;  %364 = vmatprep.subr.bf16.mxu1 %v2363_v19  ;;  %v2374_v35 = vld [vmem:[#allocation2 + $0xc8] ss:$16 sps:$4 sm:$0xff]   ;;  %v2375_v36 = vld [vmem:[#allocation2 + $0xec] ss:$16 sps:$4 sm:$0xff]   ;;  %v2474_v5 = vld [vmem:[%s3016_s5 + $0x40] sm:$0xff]   ;;  %s2020_s28 = sshll.u32 %s2753_s27, 4  ;;  %s2021_s28 = int_to_ptr.vmem [resolvable:$true] %s2020_s28 }
  0x58   :  { %v2386_v38 = vld [vmem:[#allocation5 + $0x24] ss:$8 sps:$4 sm:$0xff]   ;;  %v2377_v39 = vld [vmem:[#allocation2 + $0xe8] ss:$16 sps:$4 sm:$0xff]   ;;  %v2389_v41 = vld [vmem:[#allocation5 + $0x34] ss:$8 sps:$4 sm:$0xff]   ;;  %p2717_p5 = scmp.lt.s32.totalorder %s2021_s28, %s2021_s28 }
  0x59   :  { %v2384_v40 = vld [vmem:[#allocation5 + $0x20] ss:$8 sps:$4 sm:$0xff]   ;;  %v2387_v42 = vld [vmem:[#allocation5 + $0x30] ss:$8 sps:$4 sm:$0xff]   ;;  %v2392_v43 = vld [vmem:[#allocation5 + $0x44] ss:$8 sps:$4 sm:$0xff]  }
  0x5a   :  { %324 = vmatpush1.bf16.msra.mxu0 %v2341_v8  ;;  %365 = vmatpush1.bf16.msra.mxu1 %v2365_v22  ;;  %v2390_v44 = vld [vmem:[#allocation5 + $0x40] ss:$8 sps:$4 sm:$0xff]   ;;  %v2395_v45 = vld [vmem:[#allocation5 + $0x54] ss:$8 sps:$4 sm:$0xff]   ;;  %v2393_v46 = vld [vmem:[#allocation5 + $0x50] ss:$8 sps:$4 sm:$0xff]  }
  0x5b   :  { %325 = vmatprep.subr.bf16.mxu0 %v2342_v9  ;;  %366 = vmatprep.subr.bf16.mxu1 %v2366_v23  ;;  %v2398_v47 = vld [vmem:[#allocation5 + $0x64] ss:$8 sps:$4 sm:$0xff]   ;;  %v2396_v48 = vld [vmem:[#allocation5 + $0x60] ss:$8 sps:$4 sm:$0xff]   ;;  %v2401_v49 = vld [vmem:[#allocation5 + $0x74] ss:$8 sps:$4 sm:$0xff]  }
  0x5c   :  { %v2399_v50 = vld [vmem:[#allocation5 + $0x70] ss:$8 sps:$4 sm:$0xff]   ;;  %v2404_v51 = vld [vmem:[#allocation5 + $0x84] ss:$8 sps:$4 sm:$0xff]   ;;  %v2402_v52 = vld [vmem:[#allocation5 + $0x80] ss:$8 sps:$4 sm:$0xff]  }
  0x5d   :  { %v2407_v53 = vld [vmem:[#allocation5 + $0x94] ss:$8 sps:$4 sm:$0xff]   ;;  %v2405_v54 = vld [vmem:[#allocation5 + $0x90] ss:$8 sps:$4 sm:$0xff]   ;;  %v2410_v55 = vld [vmem:[#allocation5 + $0xa4] ss:$8 sps:$4 sm:$0xff]  }
  0x5e   :  { %326 = vmatpush1.bf16.msra.mxu0 %v2344_v13  ;;  %367 = vmatpush1.bf16.msra.mxu1 %v2368_v27  ;;  %v2408_v56 = vld [vmem:[#allocation5 + $0xa0] ss:$8 sps:$4 sm:$0xff]   ;;  %v2413_v57 = vld [vmem:[#allocation5 + $0xb4] ss:$8 sps:$4 sm:$0xff]   ;;  %v2411_v58 = vld [vmem:[#allocation5 + $0xb0] ss:$8 sps:$4 sm:$0xff]  }
  0x5f   :  { %327 = vmatprep.subr.bf16.mxu0 %v2345_v16  ;;  %368 = vmatprep.subr.bf16.mxu1 %v2369_v28  ;;  %v2416_v59 = vld [vmem:[#allocation5 + $0xc4] ss:$8 sps:$4 sm:$0xff]   ;;  %v2414_v60 = vld [vmem:[#allocation5 + $0xc0] ss:$8 sps:$4 sm:$0xff]   ;;  %v2419_v61 = vld [vmem:[#allocation5 + $0xd4] ss:$8 sps:$4 sm:$0xff]  }
  0x60   :  { %v2417_v62 = vld [vmem:[#allocation5 + $0xd0] ss:$8 sps:$4 sm:$0xff]   ;;  %v2422_v63 = vld [vmem:[#allocation5 + $0xe4] ss:$8 sps:$4 sm:$0xff]   ;;  %v2420_v1 = vld [vmem:[#allocation5 + $0xe0] ss:$8 sps:$4 sm:$0xff]  }
  0x61   :  { %v2425_v2 = vld [vmem:[#allocation5 + $0xf4] ss:$8 sps:$4 sm:$0xff]   ;;  %v2423_v3 = vld [vmem:[#allocation5 + $0xf0] ss:$8 sps:$4 sm:$0xff]   ;;  %v2428_v4 = vld [vmem:[#allocation5 + $0x104] ss:$8 sps:$4 sm:$0xff]  }
  0x62   :  { %328 = vmatpush1.bf16.msra.mxu0 %v2347_v17  ;;  %369 = vmatpush1.bf16.msra.mxu1 %v2371_v31  ;;  %v2475_v6 = vld [vmem:[%s3016_s5] sm:$0xff]   ;;  %v2476_v7 = vld [vmem:[%s3016_s5 + $0x48] sm:$0xff]   ;;  %v2478_v9 = vld [vmem:[%s3016_s5 + $0x50] sm:$0xff]   ;;  %v137_v17 = vlaneseq  ;;  %s2712_s29 = scalar_lea.vmem %s2021_s28, 128 }
  0x63   :  { %329 = vmatprep.subr.bf16.mxu0 %v2348_v20  ;;  %370 = vmatprep.subr.bf16.mxu1 %v2372_v32  ;;  %v2477_v8 = vld [vmem:[%s3016_s5 + $0x8] sm:$0xff]   ;;  %v2479_v10 = vld [vmem:[%s3016_s5 + $0x10] sm:$0xff]   ;;  %v2480_v11 = vld [vmem:[%s3016_s5 + $0x58] sm:$0xff]   ;;  %p2713_p4 = scmp.ne.s32.totalorder %s2021_s28, %s2712_s29  ;;  %p2718_p6 = scmp.lt.s32.totalorder %s2712_s29, %s2712_s29 }
  0x64   :  { %v2481_v12 = vld [vmem:[%s3016_s5 + $0x18] sm:$0xff]   ;;  %v2482_v13 = vld [vmem:[%s3016_s5 + $0x60] sm:$0xff]   ;;  %v2484_v15 = vld [vmem:[%s3016_s5 + $0x68] sm:$0xff]   ;;  %v2920_v18 = vshrl.u32 %v137_v17, 7 }
  0x65   :  { %v2483_v14 = vld [vmem:[%s3016_s5 + $0x20] sm:$0xff]   ;;  %v2485_v16 = vld [vmem:[%s3016_s5 + $0x28] sm:$0xff]   ;;  %v2471_v17 = vld [vmem:[#allocation5 + $0x1f0] ss:$8 sps:$4 sm:$0xff]   ;;  %p2719_p7 = por %p2718_p6, %p2717_p5 }
  0x66   :  { %330 = vmatpush1.bf16.msra.mxu0 %v2350_v21  ;;  %371 = vmatpush1.bf16.msra.mxu1 %v2374_v35  ;;  %v2923_v19 = vsub.s32 0, %v2920_v18  ;;  %v2928_v20 = vld [vmem:[%s3013_s2] sm:$0xf]  ;;  %v2931_v21 = vsub.s32 1, %v2920_v18 }
  0x67   :  { %331 = vmatprep.subr.bf16.mxu0 %v2351_v24  ;;  %372 = vmatprep.subr.bf16.mxu1 %v2375_v36  ;;  %v2426_v36 = vld [vmem:[#allocation5 + $0x100] ss:$8 sps:$4 sm:$0xff]   ;;  %p2720_p8 = pnand %p2719_p7, %p2713_p4 }
  0x68   :  { %v140_v22 = vrot.slane %v2928_v20, %v2923_v19  ;;  %v144_v23 = vrot.slane %v2928_v20, %v2931_v21 }
  0x6a   :  { %332 = vmatpush1.bf16.msra.mxu0 %v2353_v25  ;;  %373 = vmatpush1.bf16.msra.mxu1 %v2377_v39 }
  0x6b   :  { %811 = vmatprep.subr.bf16.mxu0 %v2380_v29  ;;  %2246 = vmatprep.subr.bf16.mxu1 %v2474_v5  ;;  %v2459_v5 = vld [vmem:[#allocation5 + $0x1b0] ss:$8 sps:$4 sm:$0xff]  }
  0x6d   :  { %350 = vmatmul.mubr.bf16.vlgmr.msra.gmra.mrb[0].mxu0 %v102_v30  ;;  %391 = vmatmul.mubr.bf16.vlgmr.msra.gmra.mrb[0].mxu1 %v102_v30 }
  0x6e   :  { %812 = vmatpush1.bf16.msra.mxu0 %v2378_v33  ;;  %2247 = vmatpush3.bf16.msra.mxu1 %v2475_v6  ;;  %v151_v33 = vsub.s32 3, %v2920_v18  ;;  %v2464_v6 = vld [vmem:[#allocation5 + $0x1c4] ss:$8 sps:$4 sm:$0xff]  }
  0x6f   :  { %813 = vmatprep.subr.bf16.mxu0 %v2383_v34  ;;  %2248 = vmatprep.subr.bf16.mxu1 %v2476_v7  ;;  %v147_v7 = vsub.s32 2, %v2920_v18 }
  0x70   :  { %v152_v39 = vrot.slane %v2928_v20, %v151_v33 }
  0x72   :  { %814 = vmatpush1.bf16.msra.mxu0 %v2381_v37  ;;  %2249 = vmatpush3.bf16.msra.mxu1 %v2477_v8  ;;  %v2462_v8 = vld [vmem:[#allocation5 + $0x1c0] ss:$8 sps:$4 sm:$0xff]  }
  0x73   :  { %815 = vmatprep.subr.bf16.mxu0 %v2386_v38  ;;  %2250 = vmatprep.subr.bf16.mxu1 %v2478_v9  ;;  %v2431_v38 = vld [vmem:[#allocation5 + $0x114] ss:$8 sps:$4 sm:$0xff]  }
  0x74   :  { %v2467_v9 = vld [vmem:[#allocation5 + $0x1d4] ss:$8 sps:$4 sm:$0xff]  }
  0x76   :  { %816 = vmatpush1.bf16.msra.mxu0 %v2384_v40  ;;  %2251 = vmatpush3.bf16.msra.mxu1 %v2479_v10  ;;  %v2429_v40 = vld [vmem:[#allocation5 + $0x110] ss:$8 sps:$4 sm:$0xff]   ;;  %v148_v10 = vrot.slane %v2928_v20, %v147_v7 }
  0x77   :  { %817 = vmatprep.subr.bf16.mxu0 %v2389_v41  ;;  %2252 = vmatprep.subr.bf16.mxu1 %v2480_v11  ;;  %v2465_v11 = vld [vmem:[#allocation5 + $0x1d0] ss:$8 sps:$4 sm:$0xff]  }
  0x78   :  { %v2486_v20 = vld [vmem:[%s3016_s5 + $0x70] sm:$0xff]  }
  0x7a   :  { %818 = vmatpush1.bf16.msra.mxu0 %v2387_v42  ;;  %2253 = vmatpush3.bf16.msra.mxu1 %v2481_v12  ;;  %v2434_v42 = vld [vmem:[#allocation5 + $0x124] ss:$8 sps:$4 sm:$0xff]  }
  0x7b   :  { %819 = vmatprep.subr.bf16.mxu0 %v2392_v43  ;;  %2254 = vmatprep.subr.bf16.mxu1 %v2482_v13  ;;  %v2470_v12 = vld [vmem:[#allocation5 + $0x1e4] ss:$8 sps:$4 sm:$0xff]  }
  0x7e   :  { %820 = vmatpush1.bf16.msra.mxu0 %v2390_v44  ;;  %2255 = vmatpush3.bf16.msra.mxu1 %v2483_v14  ;;  %v2468_v14 = vld [vmem:[#allocation5 + $0x1e0] ss:$8 sps:$4 sm:$0xff]  }
  0x7f   :  { %821 = vmatprep.subr.bf16.mxu0 %v2395_v45  ;;  %2256 = vmatprep.subr.bf16.mxu1 %v2484_v15  ;;  %v2473_v15 = vld [vmem:[#allocation5 + $0x1f4] ss:$8 sps:$4 sm:$0xff]  }
  0x82   :  { %822 = vmatpush1.bf16.msra.mxu0 %v2393_v46  ;;  %2257 = vmatpush3.bf16.msra.mxu1 %v2485_v16 }
  0x83   :  { %823 = vmatprep.subr.bf16.mxu0 %v2398_v47  ;;  %v2432_v47 = vld [vmem:[#allocation5 + $0x120] ss:$8 sps:$4 sm:$0xff]   ;;  %2258 = vmatprep.subr.bf16.mxu1 %v2486_v20  ;;  %v2540_v20 = vld [vmem:[#allocation7 + $0x1c4] ss:$16 sps:$4 sm:$0xff]  }
  0x86   :  { %824 = vmatpush1.bf16.msra.mxu0 %v2396_v48 }
  0x87   :  { %825 = vmatprep.subr.bf16.mxu0 %v2401_v49  ;;  %v2437_v49 = vld [vmem:[#allocation5 + $0x134] ss:$8 sps:$4 sm:$0xff]  }
  0x8a   :  { %826 = vmatpush1.bf16.msra.mxu0 %v2399_v50 }
  0x8b   :  { %827 = vmatprep.subr.bf16.mxu0 %v2404_v51 }
  0x8e   :  { %828 = vmatpush1.bf16.msra.mxu0 %v2402_v52  ;;  %v2435_v52 = vld [vmem:[#allocation5 + $0x130] ss:$8 sps:$4 sm:$0xff]  }
  0x8f   :  { %829 = vmatprep.subr.bf16.mxu0 %v2407_v53  ;;  %v2440_v53 = vld [vmem:[#allocation5 + $0x144] ss:$8 sps:$4 sm:$0xff]  }
  0x92   :  { %830 = vmatpush1.bf16.msra.mxu0 %v2405_v54  ;;  %v2438_v54 = vld [vmem:[#allocation5 + $0x140] ss:$8 sps:$4 sm:$0xff]  }
  0x93   :  { %831 = vmatprep.subr.bf16.mxu0 %v2410_v55  ;;  %v2443_v55 = vld [vmem:[#allocation5 + $0x154] ss:$8 sps:$4 sm:$0xff]  }
  0x96   :  { %832 = vmatpush1.bf16.msra.mxu0 %v2408_v56  ;;  %v2441_v56 = vld [vmem:[#allocation5 + $0x150] ss:$8 sps:$4 sm:$0xff]  }
  0x97   :  { %833 = vmatprep.subr.bf16.mxu0 %v2413_v57  ;;  %v2446_v57 = vld [vmem:[#allocation5 + $0x164] ss:$8 sps:$4 sm:$0xff]  }
  0x9a   :  { %834 = vmatpush1.bf16.msra.mxu0 %v2411_v58  ;;  %v2444_v58 = vld [vmem:[#allocation5 + $0x160] ss:$8 sps:$4 sm:$0xff]  }
  0x9b   :  { %835 = vmatprep.subr.bf16.mxu0 %v2416_v59  ;;  %v2449_v59 = vld [vmem:[#allocation5 + $0x174] ss:$8 sps:$4 sm:$0xff]  }
  0x9e   :  { %836 = vmatpush1.bf16.msra.mxu0 %v2414_v60  ;;  %v2447_v60 = vld [vmem:[#allocation5 + $0x170] ss:$8 sps:$4 sm:$0xff]  }
  0x9f   :  { %837 = vmatprep.subr.bf16.mxu0 %v2419_v61  ;;  %v2452_v61 = vld [vmem:[#allocation5 + $0x184] ss:$8 sps:$4 sm:$0xff]  }
  0xa2   :  { %838 = vmatpush1.bf16.msra.mxu0 %v2417_v62  ;;  %v2450_v62 = vld [vmem:[#allocation5 + $0x180] ss:$8 sps:$4 sm:$0xff]  }
  0xa3   :  { %839 = vmatprep.subr.bf16.mxu0 %v2422_v63  ;;  %v2455_v63 = vld [vmem:[#allocation5 + $0x194] ss:$8 sps:$4 sm:$0xff]  }
  0xa6   :  { %840 = vmatpush1.bf16.msra.mxu0 %v2420_v1  ;;  %v2453_v1 = vld [vmem:[#allocation5 + $0x190] ss:$8 sps:$4 sm:$0xff]  }
  0xa7   :  { %841 = vmatprep.subr.bf16.mxu0 %v2425_v2  ;;  %v2458_v2 = vld [vmem:[#allocation5 + $0x1a4] ss:$8 sps:$4 sm:$0xff]  }
  0xaa   :  { %842 = vmatpush1.bf16.msra.mxu0 %v2423_v3  ;;  %v2456_v3 = vld [vmem:[#allocation5 + $0x1a0] ss:$8 sps:$4 sm:$0xff]  }
  0xab   :  { %852 = vmatprep.subr.bf16.mxu0 %v2428_v4  ;;  %v2461_v4 = vld [vmem:[#allocation5 + $0x1b4] ss:$8 sps:$4 sm:$0xff]  }
 0x140   :  { %v351_v24 = vpop.f32.mrb[0].mxu0  ;;  %v392_v41 = vpop.f32.mrb[0].mxu1 }
 0x141   :  { %v352_v25 = vadd.f32 %v351_v24, %v140_v22  ;;  %v353_v26 = vpop.f32.mrb[1].mxu0  ;;  %v394_v43 = vpop.f32.mrb[1].mxu1  ;;  %v393_v13 = vadd.f32 %v392_v41, %v148_v10  ;;  %v2487_v24 = vld [vmem:[%s3016_s5 + $0x30] sm:$0xff]  }
 0x142   :  { %v354_v27 = vadd.f32 %v353_v26, %v144_v23  ;;  %v355_v28 = vpop.f32.mrb[2].mxu0  ;;  %v395_v44 = vadd.f32 %v394_v43, %v152_v39  ;;  %v396_v45 = vpop.f32.mrb[2].mxu1  ;;  %2259 = vmatpush3.bf16.msra.mxu1 %v2487_v24  ;;  %v2489_v26 = vld [vmem:[%s3016_s5 + $0x38] sm:$0xff]   ;;  %v2490_v43 = vld [vmem:[%s3018_s7] ss:$8 sps:$4 sm:$0xff]  }
 0x143   :  { %vm399_vm0 = vcmp.gt.f32.partialorder %v352_v25, 0.0  ;;  %v403_v29 = vmul.f32 0.2, %v352_v25  ;;  %v356_v30 = vpop.f32.mrb[3].mxu0  ;;  %v397_v46 = vpop.f32.mrb[3].mxu1  ;;  %vm401_vm3 = vcmp.gt.f32.partialorder %v393_v13, 0.0 }
 0x144   :  { %vm400_vm1 = vcmp.gt.f32.partialorder %v354_v27, 0.0  ;;  %v404_v31 = vmul.f32 0.2, %v354_v27  ;;  %vm402_vm2 = vcmp.gt.f32.partialorder %v395_v44, 0.0  ;;  %v406_v48 = vmul.f32 0.2, %v395_v44 }
 0x145   :  { %v407_v32 = vsel %vm399_vm0, %v352_v25, %v403_v29  ;;  %v405_v16 = vmul.f32 0.2, %v393_v13  ;;  %v2488_v25 = vld [vmem:[%s3016_s5 + $0x78] sm:$0xff]   ;;  %v479_v28 = vld [vmem:[%s3015_s4] sm:$0x3] }
 0x146   :  { %v408_v34 = vsel %vm400_vm1, %v354_v27, %v404_v31  ;;  %v411_v37 = vpack.c.bf16 %v407_v32, %v407_v32  ;;  %v410_v50 = vsel %vm402_vm2, %v395_v44, %v406_v48  ;;  %2260 = vmatprep.subr.bf16.mxu1 %v2488_v25  ;;  %v2492_v27 = vld [vmem:[%s3018_s7 + $0x4] ss:$8 sps:$4 sm:$0xff]   ;;  %v484_v29 = vrot.slane %v479_v28, %v2923_v19  ;;  %v2495_v45 = vld [vmem:[%s3018_s7 + $0x14] ss:$8 sps:$4 sm:$0xff]   ;;  %v2493_v46 = vld [vmem:[%s3018_s7 + $0x10] ss:$8 sps:$4 sm:$0xff]  }
 0x147   :  { %v412_v35 = vpack.c.bf16 %v408_v34, %v408_v34  ;;  %v414_v51 = vpack.c.bf16 %v410_v50, %v410_v50  ;;  %v409_v22 = vsel %vm401_vm3, %v393_v13, %v405_v16  ;;  %2261 = vmatpush3.bf16.msra.mxu1 %v2489_v26  ;;  %v488_v30 = vrot.slane %v479_v28, %v2931_v21  ;;  %v2525_v10 = vld [vmem:[#allocation7 + $0x124] ss:$16 sps:$4 sm:$0xff]   ;;  %v2526_v13 = vld [vmem:[#allocation7 + $0x140] ss:$16 sps:$4 sm:$0xff]  }
 0x148   :  { %v413_v23 = vpack.c.bf16 %v409_v22, %v409_v22  ;;  %1117 = vmatprep.subr.bf16.mxu1 %v2492_v27  ;;  %v2534_v16 = vld [vmem:[#allocation7 + $0x184] ss:$16 sps:$4 sm:$0xff]   ;;  %v2538_v24 = vld [vmem:[#allocation7 + $0x1c0] ss:$16 sps:$4 sm:$0xff]   ;;  %v2546_v27 = vld [vmem:[#allocation7 + $0xc] ss:$16 sps:$4 sm:$0xff]  }
 0x149   :  { %843 = vmatprep.mubr.bf16.mxu0 %v412_v35  ;;  %v2537_v22 = vld [vmem:[#allocation7 + $0x1a4] ss:$16 sps:$4 sm:$0xff]   ;;  %v2541_v26 = vld [vmem:[#allocation7 + $0x1e0] ss:$16 sps:$4 sm:$0xff]  }
 0x14a   :  { %844 = vmatmul.mubr.bf16.vlgmr.msra.gmra.mrb[4].mxu0 %v411_v37  ;;  %v2543_v25 = vld [vmem:[#allocation7 + $0x1e4] ss:$16 sps:$4 sm:$0xff]  }
 0x14b   :  { %853 = vmatpush1.bf16.msra.mxu0 %v2426_v36  ;;  %884 = vmatprep.mubr.bf16.mxu0 %v414_v51  ;;  %v2592_v28 = vld [vmem:[#allocation8 + $0x40] sm:$0xff]  }
 0x14c   :  { %854 = vmatprep.subr.bf16.mxu0 %v2431_v38 }
 0x14f   :  { %855 = vmatpush1.bf16.msra.mxu0 %v2429_v40 }
 0x150   :  { %856 = vmatprep.subr.bf16.mxu0 %v2434_v42 }
 0x153   :  { %857 = vmatpush1.bf16.msra.mxu0 %v2432_v47  ;;  %v2498_v47 = vld [vmem:[#allocation7 + $0x4] ss:$16 sps:$4 sm:$0xff]  }
 0x154   :  { %858 = vmatprep.subr.bf16.mxu0 %v2437_v49  ;;  %v2127_v49 = vld [vmem:[%s3017_s6] ss:$0 sm:$0xff] }
 0x157   :  { %859 = vmatpush1.bf16.msra.mxu0 %v2435_v52 }
 0x158   :  { %860 = vmatprep.subr.bf16.mxu0 %v2440_v53 }
 0x15b   :  { %861 = vmatpush1.bf16.msra.mxu0 %v2438_v54  ;;  %v2496_v54 = vld [vmem:[#allocation7] ss:$16 sps:$4 sm:$0xff]  }
 0x15c   :  { %862 = vmatprep.subr.bf16.mxu0 %v2443_v55 }
 0x15f   :  { %863 = vmatpush1.bf16.msra.mxu0 %v2441_v56  ;;  %v2501_v56 = vld [vmem:[#allocation7 + $0x24] ss:$16 sps:$4 sm:$0xff]  }
 0x160   :  { %864 = vmatprep.subr.bf16.mxu0 %v2446_v57  ;;  %v2499_v57 = vld [vmem:[#allocation7 + $0x20] ss:$16 sps:$4 sm:$0xff]  }
 0x163   :  { %865 = vmatpush1.bf16.msra.mxu0 %v2444_v58  ;;  %v2504_v58 = vld [vmem:[#allocation7 + $0x44] ss:$16 sps:$4 sm:$0xff]  }
 0x164   :  { %866 = vmatprep.subr.bf16.mxu0 %v2449_v59  ;;  %v2502_v59 = vld [vmem:[#allocation7 + $0x40] ss:$16 sps:$4 sm:$0xff]  }
 0x167   :  { %867 = vmatpush1.bf16.msra.mxu0 %v2447_v60  ;;  %v2507_v60 = vld [vmem:[#allocation7 + $0x64] ss:$16 sps:$4 sm:$0xff]  }
 0x168   :  { %868 = vmatprep.subr.bf16.mxu0 %v2452_v61  ;;  %v2505_v61 = vld [vmem:[#allocation7 + $0x60] ss:$16 sps:$4 sm:$0xff]  }
 0x16b   :  { %869 = vmatpush1.bf16.msra.mxu0 %v2450_v62  ;;  %v2510_v62 = vld [vmem:[#allocation7 + $0x84] ss:$16 sps:$4 sm:$0xff]  }
 0x16c   :  { %870 = vmatprep.subr.bf16.mxu0 %v2455_v63  ;;  %v2508_v63 = vld [vmem:[#allocation7 + $0x80] ss:$16 sps:$4 sm:$0xff]  }
 0x16f   :  { %871 = vmatpush1.bf16.msra.mxu0 %v2453_v1  ;;  %v2513_v1 = vld [vmem:[#allocation7 + $0xa4] ss:$16 sps:$4 sm:$0xff]  }
 0x170   :  { %872 = vmatprep.subr.bf16.mxu0 %v2458_v2  ;;  %v2511_v2 = vld [vmem:[#allocation7 + $0xa0] ss:$16 sps:$4 sm:$0xff]  }
 0x173   :  { %873 = vmatpush1.bf16.msra.mxu0 %v2456_v3  ;;  %v2516_v3 = vld [vmem:[#allocation7 + $0xc4] ss:$16 sps:$4 sm:$0xff]  }
 0x174   :  { %874 = vmatprep.subr.bf16.mxu0 %v2461_v4  ;;  %v2514_v4 = vld [vmem:[#allocation7 + $0xc0] ss:$16 sps:$4 sm:$0xff]  }
 0x177   :  { %875 = vmatpush1.bf16.msra.mxu0 %v2459_v5  ;;  %v2519_v5 = vld [vmem:[#allocation7 + $0xe4] ss:$16 sps:$4 sm:$0xff]  }
 0x178   :  { %876 = vmatprep.subr.bf16.mxu0 %v2464_v6  ;;  %v2517_v6 = vld [vmem:[#allocation7 + $0xe0] ss:$16 sps:$4 sm:$0xff]  }
 0x17b   :  { %877 = vmatpush1.bf16.msra.mxu0 %v2462_v8  ;;  %v2522_v8 = vld [vmem:[#allocation7 + $0x104] ss:$16 sps:$4 sm:$0xff]  }
 0x17c   :  { %878 = vmatprep.subr.bf16.mxu0 %v2467_v9  ;;  %v2520_v9 = vld [vmem:[#allocation7 + $0x100] ss:$16 sps:$4 sm:$0xff]  }
 0x17f   :  { %879 = vmatpush1.bf16.msra.mxu0 %v2465_v11  ;;  %v2523_v11 = vld [vmem:[#allocation7 + $0x120] ss:$16 sps:$4 sm:$0xff]  }
 0x180   :  { %880 = vmatprep.subr.bf16.mxu0 %v2470_v12  ;;  %v2528_v12 = vld [vmem:[#allocation7 + $0x144] ss:$16 sps:$4 sm:$0xff]  }
 0x183   :  { %881 = vmatpush1.bf16.msra.mxu0 %v2468_v14  ;;  %v2531_v14 = vld [vmem:[#allocation7 + $0x164] ss:$16 sps:$4 sm:$0xff]  }
 0x184   :  { %882 = vmatprep.subr.bf16.mxu0 %v2473_v15  ;;  %v2529_v15 = vld [vmem:[#allocation7 + $0x160] ss:$16 sps:$4 sm:$0xff]  }
 0x187   :  { %883 = vmatpush1.bf16.msra.mxu0 %v2471_v17  ;;  %v2532_v17 = vld [vmem:[#allocation7 + $0x180] ss:$16 sps:$4 sm:$0xff]  }
 0x188   :  { %2268 = vmatprep.subr.bf16.mxu0 %v2592_v28  ;;  %v2605_v28 = vld [vmem:[#allocation8 + $0x30] sm:$0xff]  }
 0x18a   :  { %885 = vmatmul.mubr.bf16.vlgmr.msra.gmra.mrb[4].mxu0 %v413_v23  ;;  %v2535_v23 = vld [vmem:[#allocation7 + $0x1a0] ss:$16 sps:$4 sm:$0xff]  }
 0x25d   :  { %v886_v31 = vpop.f32.mrb[4].mxu0 }
 0x25e   :  { %v2312_v32 = vadd.f32 %v886_v31, %v484_v29  ;;  %v888_v34 = vpop.f32.mrb[5].mxu0  ;;  %v2593_v29 = vld [vmem:[#allocation8] sm:$0xff]   ;;  %v2595_v31 = vld [vmem:[#allocation8 + $0x8] sm:$0xff]  }
 0x25f   :  { %v2313_v35 = vadd.f32 %v888_v34, %v488_v30  ;;  %v890_v36 = vpop.f32.mrb[6].mxu0  ;;  %v2594_v30 = vld [vmem:[#allocation8 + $0x48] sm:$0xff]   ;;  %2269 = vmatpush3.bf16.msra.mxu0 %v2593_v29  ;;  %v2597_v34 = vld [vmem:[#allocation8 + $0x10] sm:$0xff]   ;;  %v2606_v29 = vld [vmem:[#allocation8 + $0x78] sm:$0xff]  }
 0x260   :  { %vm893_vm4 = vcmp.gt.f32.partialorder %v2312_v32, 0.0  ;;  %v895_v37 = vmul.f32 0.2, %v2312_v32  ;;  %v891_v38 = vpop.f32.mrb[7].mxu0  ;;  %2270 = vmatprep.subr.bf16.mxu0 %v2594_v30  ;;  %v2599_v36 = vld [vmem:[#allocation8 + $0x18] sm:$0xff]  }
 0x261   :  { %vm894_vm5 = vcmp.gt.f32.partialorder %v2313_v35, 0.0  ;;  %v896_v39 = vmul.f32 0.2, %v2313_v35  ;;  %v2601_v38 = vld [vmem:[#allocation8 + $0x20] sm:$0xff]   ;;  %v2607_v30 = vld [vmem:[#allocation8 + $0x38] sm:$0xff]  }
 0x262   :  { %v897_v40 = vsel %vm893_vm4, %v2312_v32, %v895_v37  ;;  %v2596_v32 = vld [vmem:[#allocation8 + $0x50] sm:$0xff]   ;;  %v2600_v37 = vld [vmem:[#allocation8 + $0x60] sm:$0xff]  }
 0x263   :  { %v898_v41 = vsel %vm894_vm5, %v2313_v35, %v896_v39  ;;  %v899_v44 = vpack.c.bf16 %v897_v40, %v897_v40  ;;  %2271 = vmatpush3.bf16.msra.mxu0 %v2595_v31  ;;  %v2598_v35 = vld [vmem:[#allocation8 + $0x58] sm:$0xff]   ;;  %v2602_v39 = vld [vmem:[#allocation8 + $0x68] sm:$0xff]   ;;  %v2608_v31 = vld [vmem:[#allocation8 + $0xc0] sm:$0xff]  }
 0x264   :  { %v900_v42 = vpack.c.bf16 %v898_v41, %v898_v41  ;;  %2272 = vmatprep.subr.bf16.mxu0 %v2596_v32  ;;  %v2603_v40 = vld [vmem:[#allocation8 + $0x28] sm:$0xff]   ;;  %v1081_v41 = vld [vmem:[%s3019_s8] sm:$0x3] }
 0x265   :  { %v1230_v32 = vld [vmem:[%s3021_s10] sm:$0xf] }
 0x266   :  { %1068 = vmatprep.mubr.bf16.mxu1 %v900_v42  ;;  %v1086_v42 = vrot.slane %v1081_v41, %v2923_v19 }
 0x267   :  { %1069 = vmatmul.mubr.bf16.vlgmr.msra.gmra.mrb[4].mxu1 %v899_v44  ;;  %2273 = vmatpush3.bf16.msra.mxu0 %v2597_v34  ;;  %v1235_v34 = vrot.slane %v1230_v32, %v2923_v19  ;;  %v2611_v19 = vld [vmem:[#allocation8 + $0x88] sm:$0xff]  }
 0x268   :  { %1118 = vmatpush1.bf16.msra.mxu1 %v2490_v43  ;;  %1149 = vmatprep.mubr.bf16.mxu1 %v2752_v0  ;;  %v1090_v43 = vrot.slane %v1081_v41, %v2931_v21 }
 0x269   :  { %1119 = vmatprep.subr.bf16.mxu1 %v2495_v45  ;;  %2274 = vmatprep.subr.bf16.mxu0 %v2598_v35  ;;  %v1239_v35 = vrot.slane %v1230_v32, %v2931_v21  ;;  %v2612_v21 = vld [vmem:[#allocation8 + $0xd0] sm:$0xff]  }
 0x26b   :  { %2275 = vmatpush3.bf16.msra.mxu0 %v2599_v36 }
 0x26c   :  { %1120 = vmatpush1.bf16.msra.mxu1 %v2493_v46  ;;  %2276 = vmatprep.subr.bf16.mxu0 %v2600_v37 }
 0x26d   :  { %1572 = vmatprep.subr.bf16.mxu1 %v2498_v47 }
 0x26f   :  { %2277 = vmatpush3.bf16.msra.mxu0 %v2601_v38 }
 0x270   :  { %2278 = vmatprep.subr.bf16.mxu0 %v2602_v39 }
 0x273   :  { %2279 = vmatpush3.bf16.msra.mxu0 %v2603_v40 }
 0x33a   :  { %v2262_v48 = vpop.f32.mrb[4].mxu1 }
 0x33b   :  { %v2263_v50 = vpop.f32.mrb[5].mxu1 }
 0x33c   :  { %v2264_v51 = vadd.f32 %v2263_v50, %v2262_v48  ;;  %v2265_v0 = vpop.f32.mrb[6].mxu1 }
 0x33d   :  { %v2266_v52 = vpop.f32.mrb[7].mxu1 }
 0x33e   :  { %v1071_v53 = vadd.f32 %v2264_v51, %v2127_v49 }
 0x340   :  { %v1076_v55 = vpack.c.bf16 %v1071_v53, %v1071_v53 }
 0x342   :  { %2148 = vmatmul.mubr.msk.bf16.vlgmr.msra.gmra.mrb[8].mxu1 %vm1113_vm6, %v1076_v55 }
 0x343   :  { %1573 = vmatpush1.bf16.msra.mxu1 %v2496_v54  ;;  %v2544_v54 = vld [vmem:[#allocation7 + $0x8] ss:$16 sps:$4 sm:$0xff]  }
 0x344   :  { %1574 = vmatprep.subr.bf16.mxu1 %v2501_v56  ;;  %v2549_v56 = vld [vmem:[#allocation7 + $0x2c] ss:$16 sps:$4 sm:$0xff]  }
 0x347   :  { %1575 = vmatpush1.bf16.msra.mxu1 %v2499_v57  ;;  %v2547_v57 = vld [vmem:[#allocation7 + $0x28] ss:$16 sps:$4 sm:$0xff]  }
 0x348   :  { %1576 = vmatprep.subr.bf16.mxu1 %v2504_v58  ;;  %v2552_v58 = vld [vmem:[#allocation7 + $0x4c] ss:$16 sps:$4 sm:$0xff]  }
 0x34b   :  { %1577 = vmatpush1.bf16.msra.mxu1 %v2502_v59  ;;  %v2550_v59 = vld [vmem:[#allocation7 + $0x48] ss:$16 sps:$4 sm:$0xff]  }
 0x34c   :  { %1578 = vmatprep.subr.bf16.mxu1 %v2507_v60  ;;  %v2555_v60 = vld [vmem:[#allocation7 + $0x6c] ss:$16 sps:$4 sm:$0xff]  }
 0x34f   :  { %1579 = vmatpush1.bf16.msra.mxu1 %v2505_v61  ;;  %v2553_v61 = vld [vmem:[#allocation7 + $0x68] ss:$16 sps:$4 sm:$0xff]  }
 0x350   :  { %1580 = vmatprep.subr.bf16.mxu1 %v2510_v62  ;;  %v2558_v62 = vld [vmem:[#allocation7 + $0x8c] ss:$16 sps:$4 sm:$0xff]  }
 0x353   :  { %1581 = vmatpush1.bf16.msra.mxu1 %v2508_v63  ;;  %v2556_v63 = vld [vmem:[#allocation7 + $0x88] ss:$16 sps:$4 sm:$0xff]  }
 0x354   :  { %1582 = vmatprep.subr.bf16.mxu1 %v2513_v1  ;;  %v2561_v1 = vld [vmem:[#allocation7 + $0xac] ss:$16 sps:$4 sm:$0xff]  }
 0x357   :  { %1583 = vmatpush1.bf16.msra.mxu1 %v2511_v2  ;;  %v2559_v2 = vld [vmem:[#allocation7 + $0xa8] ss:$16 sps:$4 sm:$0xff]  }
 0x358   :  { %1584 = vmatprep.subr.bf16.mxu1 %v2516_v3  ;;  %v2564_v3 = vld [vmem:[#allocation7 + $0xcc] ss:$16 sps:$4 sm:$0xff]  }
 0x35b   :  { %1585 = vmatpush1.bf16.msra.mxu1 %v2514_v4  ;;  %v2562_v4 = vld [vmem:[#allocation7 + $0xc8] ss:$16 sps:$4 sm:$0xff]  }
 0x35c   :  { %1586 = vmatprep.subr.bf16.mxu1 %v2519_v5  ;;  %v2567_v5 = vld [vmem:[#allocation7 + $0xec] ss:$16 sps:$4 sm:$0xff]  }
 0x35f   :  { %1587 = vmatpush1.bf16.msra.mxu1 %v2517_v6  ;;  %v2565_v6 = vld [vmem:[#allocation7 + $0xe8] ss:$16 sps:$4 sm:$0xff]  }
 0x360   :  { %1588 = vmatprep.subr.bf16.mxu1 %v2522_v8  ;;  %v2570_v8 = vld [vmem:[#allocation7 + $0x10c] ss:$16 sps:$4 sm:$0xff]  }
 0x363   :  { %1589 = vmatpush1.bf16.msra.mxu1 %v2520_v9  ;;  %v2568_v9 = vld [vmem:[#allocation7 + $0x108] ss:$16 sps:$4 sm:$0xff]  }
 0x364   :  { %1590 = vmatprep.subr.bf16.mxu1 %v2525_v10  ;;  %v2573_v10 = vld [vmem:[#allocation7 + $0x12c] ss:$16 sps:$4 sm:$0xff]  }
 0x367   :  { %1591 = vmatpush1.bf16.msra.mxu1 %v2523_v11  ;;  %v2571_v11 = vld [vmem:[#allocation7 + $0x128] ss:$16 sps:$4 sm:$0xff]  }
 0x368   :  { %1592 = vmatprep.subr.bf16.mxu1 %v2528_v12  ;;  %v2576_v12 = vld [vmem:[#allocation7 + $0x14c] ss:$16 sps:$4 sm:$0xff]  }
 0x36b   :  { %1593 = vmatpush1.bf16.msra.mxu1 %v2526_v13  ;;  %v2574_v13 = vld [vmem:[#allocation7 + $0x148] ss:$16 sps:$4 sm:$0xff]  }
 0x36c   :  { %1594 = vmatprep.subr.bf16.mxu1 %v2531_v14  ;;  %v2579_v14 = vld [vmem:[#allocation7 + $0x16c] ss:$16 sps:$4 sm:$0xff]  }
 0x36f   :  { %1595 = vmatpush1.bf16.msra.mxu1 %v2529_v15  ;;  %v2577_v15 = vld [vmem:[#allocation7 + $0x168] ss:$16 sps:$4 sm:$0xff]  }
 0x370   :  { %1596 = vmatprep.subr.bf16.mxu1 %v2534_v16  ;;  %v2582_v16 = vld [vmem:[#allocation7 + $0x18c] ss:$16 sps:$4 sm:$0xff]  }
 0x373   :  { %1597 = vmatpush1.bf16.msra.mxu1 %v2532_v17  ;;  %v2580_v17 = vld [vmem:[#allocation7 + $0x188] ss:$16 sps:$4 sm:$0xff]  }
 0x374   :  { %1598 = vmatprep.subr.bf16.mxu1 %v2537_v22  ;;  %v2585_v22 = vld [vmem:[#allocation7 + $0x1ac] ss:$16 sps:$4 sm:$0xff]  }
 0x377   :  { %1599 = vmatpush1.bf16.msra.mxu1 %v2535_v23  ;;  %v2583_v23 = vld [vmem:[#allocation7 + $0x1a8] ss:$16 sps:$4 sm:$0xff]  }
 0x378   :  { %1600 = vmatprep.subr.bf16.mxu1 %v2540_v20  ;;  %v2588_v20 = vld [vmem:[#allocation7 + $0x1cc] ss:$16 sps:$4 sm:$0xff]  }
 0x37b   :  { %1601 = vmatpush1.bf16.msra.mxu1 %v2538_v24  ;;  %v2586_v24 = vld [vmem:[#allocation7 + $0x1c8] ss:$16 sps:$4 sm:$0xff]  }
 0x37c   :  { %1602 = vmatprep.subr.bf16.mxu1 %v2543_v25  ;;  %v2591_v25 = vld [vmem:[#allocation7 + $0x1ec] ss:$16 sps:$4 sm:$0xff]  }
 0x37f   :  { %1603 = vmatpush1.bf16.msra.mxu1 %v2541_v26  ;;  %v2589_v26 = vld [vmem:[#allocation7 + $0x1e8] ss:$16 sps:$4 sm:$0xff]  }
 0x380   :  { %1613 = vmatprep.subr.bf16.mxu1 %v2546_v27  ;;  %v2604_v27 = vld [vmem:[#allocation8 + $0x70] sm:$0xff]  }
 0x381   :  { %2280 = vmatprep.subr.bf16.mxu0 %v2604_v27 }
 0x382   :  { %2281 = vmatpush3.bf16.msra.mxu0 %v2605_v28 }
 0x383   :  { %2282 = vmatprep.subr.bf16.mxu0 %v2606_v29 }
 0x386   :  { %2283 = vmatpush3.bf16.msra.mxu0 %v2607_v30 }
 0x387   :  { %2290 = vmatprep.subr.bf16.mxu0 %v2608_v31 }
 0x415   :  { %v1151_v44 = vpop.f32.mrb[8].mxu1 }
 0x416   :  { %v1152_v45 = vadd.f32 %v1151_v44, %v1086_v42  ;;  %v1153_v46 = vpop.f32.mrb[9].mxu1 }
 0x417   :  { %v1154_v47 = vadd.f32 %v1153_v46, %v1090_v43  ;;  %v1155_v48 = vpop.f32.mrb[10].mxu1 }
 0x418   :  { %vm1158_vm7 = vcmp.gt.f32.partialorder %v1152_v45, 0.0  ;;  %v1160_v49 = vmul.f32 0.2, %v1152_v45  ;;  %v1156_v50 = vpop.f32.mrb[11].mxu1 }
 0x419   :  { %vm1159_vm8 = vcmp.gt.f32.partialorder %v1154_v47, 0.0  ;;  %v1161_v51 = vmul.f32 0.2, %v1154_v47  ;;  %v2613_v50 = vld [vmem:[#allocation8 + $0x90] sm:$0xff]  }
 0x41a   :  { %v1162_v0 = vsel %vm1158_vm7, %v1152_v45, %v1160_v49  ;;  %v2610_v49 = vld [vmem:[#allocation8 + $0xc8] sm:$0xff]  }
 0x41b   :  { %v1163_v52 = vsel %vm1159_vm8, %v1154_v47, %v1161_v51  ;;  %v2983_v55 = vpack.c.bf16 %v1162_v0, %v1162_v0  ;;  %v2609_v47 = vld [vmem:[#allocation8 + $0x80] sm:$0xff]   ;;  %v2614_v51 = vld [vmem:[#allocation8 + $0xd8] sm:$0xff]  }
 0x41c   :  { %v1165_v53 = vpack.c.bf16 %v1163_v52, %v1163_v52  ;;  %v2615_v0 = vld [vmem:[#allocation8 + $0x98] sm:$0xff]   ;;  %v2616_v52 = vld [vmem:[#allocation8 + $0xe0] sm:$0xff]  }
 0x41e   :  { %1604 = vmatprep.mubr.bf16.mxu1 %v1165_v53 }
 0x41f   :  { %1605 = vmatmul.mubr.bf16.vlgmr.msra.gmra.mrb[12].mxu1 %v2983_v55 }
 0x420   :  { %1614 = vmatpush1.bf16.msra.mxu1 %v2544_v54  ;;  %1645 = vmatprep.mubr.bf16.mxu1 %v1165_v53  ;;  %v2617_v53 = vld [vmem:[#allocation8 + $0xa0] sm:$0xff]   ;;  %v2618_v54 = vld [vmem:[#allocation8 + $0xe8] sm:$0xff]  }
 0x421   :  { %1615 = vmatprep.subr.bf16.mxu1 %v2549_v56  ;;  %v2620_v56 = vld [vmem:[#allocation8 + $0xf0] sm:$0xff]  }
 0x424   :  { %1616 = vmatpush1.bf16.msra.mxu1 %v2547_v57  ;;  %v2621_v57 = vld [vmem:[#allocation8 + $0xb0] sm:$0xff]  }
 0x425   :  { %1617 = vmatprep.subr.bf16.mxu1 %v2552_v58  ;;  %v2622_v58 = vld [vmem:[#allocation8 + $0xf8] sm:$0xff]  }
 0x428   :  { %1618 = vmatpush1.bf16.msra.mxu1 %v2550_v59  ;;  %v2623_v59 = vld [vmem:[#allocation8 + $0xb8] sm:$0xff]  }
 0x429   :  { %1619 = vmatprep.subr.bf16.mxu1 %v2555_v60  ;;  %v1243_v60 = vrot.slane %v1230_v32, %v147_v7 }
 0x42c   :  { %1620 = vmatpush1.bf16.msra.mxu1 %v2553_v61  ;;  %v1247_v61 = vrot.slane %v1230_v32, %v151_v33 }
 0x42d   :  { %1621 = vmatprep.subr.bf16.mxu1 %v2558_v62 }
 0x430   :  { %1622 = vmatpush1.bf16.msra.mxu1 %v2556_v63 }
 0x431   :  { %1623 = vmatprep.subr.bf16.mxu1 %v2561_v1 }
 0x434   :  { %1624 = vmatpush1.bf16.msra.mxu1 %v2559_v2 }
 0x435   :  { %1625 = vmatprep.subr.bf16.mxu1 %v2564_v3 }
 0x438   :  { %1626 = vmatpush1.bf16.msra.mxu1 %v2562_v4 }
 0x439   :  { %1627 = vmatprep.subr.bf16.mxu1 %v2567_v5 }
 0x43c   :  { %1628 = vmatpush1.bf16.msra.mxu1 %v2565_v6 }
 0x43d   :  { %1629 = vmatprep.subr.bf16.mxu1 %v2570_v8 }
 0x440   :  { %1630 = vmatpush1.bf16.msra.mxu1 %v2568_v9 }
 0x441   :  { %1631 = vmatprep.subr.bf16.mxu1 %v2573_v10 }
 0x444   :  { %1632 = vmatpush1.bf16.msra.mxu1 %v2571_v11 }
 0x445   :  { %1633 = vmatprep.subr.bf16.mxu1 %v2576_v12 }
 0x448   :  { %1634 = vmatpush1.bf16.msra.mxu1 %v2574_v13 }
 0x449   :  { %1635 = vmatprep.subr.bf16.mxu1 %v2579_v14  ;;  %v2213_v14 = vld [vmem:[%s3023_s12] ss:$0 sm:$0xff] }
 0x44c   :  { %1636 = vmatpush1.bf16.msra.mxu1 %v2577_v15 }
 0x44d   :  { %1637 = vmatprep.subr.bf16.mxu1 %v2582_v16 }
 0x450   :  { %1638 = vmatpush1.bf16.msra.mxu1 %v2580_v17 }
 0x451   :  { %1639 = vmatprep.subr.bf16.mxu1 %v2585_v22 }
 0x454   :  { %1640 = vmatpush1.bf16.msra.mxu1 %v2583_v23 }
 0x455   :  { %1641 = vmatprep.subr.bf16.mxu1 %v2588_v20 }
 0x458   :  { %1642 = vmatpush1.bf16.msra.mxu1 %v2586_v24 }
 0x459   :  { %1643 = vmatprep.subr.bf16.mxu1 %v2591_v25 }
 0x45c   :  { %1644 = vmatpush1.bf16.msra.mxu1 %v2589_v26 }
 0x45f   :  { %1646 = vmatmul.mubr.bf16.vlgmr.msra.gmra.mrb[16].mxu1 %v2983_v55  ;;  %v2619_v55 = vld [vmem:[#allocation8 + $0xa8] sm:$0xff]  }
 0x4f2   :  { %v1606_v36 = vpop.f32.mrb[12].mxu1 }
 0x4f3   :  { %v1607_v37 = vadd.f32 %v1606_v36, %v1235_v34  ;;  %v1608_v38 = vpop.f32.mrb[13].mxu1 }
 0x4f4   :  { %v1609_v39 = vadd.f32 %v1608_v38, %v1239_v35  ;;  %v1610_v40 = vpop.f32.mrb[14].mxu1 }
 0x4f5   :  { %vm1654_vm9 = vcmp.gt.f32.partialorder %v1607_v37, 0.0  ;;  %v1658_v41 = vmul.f32 0.2, %v1607_v37  ;;  %v1611_v42 = vpop.f32.mrb[15].mxu1 }
 0x4f6   :  { %vm1655_vm10 = vcmp.gt.f32.partialorder %v1609_v39, 0.0  ;;  %v1659_v43 = vmul.f32 0.2, %v1609_v39 }
 0x4f7   :  { %v1662_v44 = vsel %vm1654_vm9, %v1607_v37, %v1658_v41 }
 0x4f8   :  { %v1663_v45 = vsel %vm1655_vm10, %v1609_v39, %v1659_v43  ;;  %v1666_v48 = vpack.c.bf16 %v1662_v44, %v1662_v44 }
 0x4f9   :  { %v1667_v46 = vpack.c.bf16 %v1663_v45, %v1663_v45 }
 0x4fb   :  { %1965 = vmatprep.mubr.bf16.mxu0 %v1667_v46 }
 0x4fc   :  { %1966 = vmatmul.mubr.bf16.vlgmr.msra.gmra.mrb[8].mxu0 %v1666_v48 }
 0x4fd   :  { %2291 = vmatpush3.bf16.msra.mxu0 %v2609_v47 }
 0x4fe   :  { %2292 = vmatprep.subr.bf16.mxu0 %v2610_v49 }
 0x501   :  { %2293 = vmatpush3.bf16.msra.mxu0 %v2611_v19 }
 0x502   :  { %2294 = vmatprep.subr.bf16.mxu0 %v2612_v21 }
 0x505   :  { %2295 = vmatpush3.bf16.msra.mxu0 %v2613_v50 }
 0x506   :  { %2296 = vmatprep.subr.bf16.mxu0 %v2614_v51 }
 0x509   :  { %2297 = vmatpush3.bf16.msra.mxu0 %v2615_v0 }
 0x50a   :  { %2298 = vmatprep.subr.bf16.mxu0 %v2616_v52 }
 0x50d   :  { %2299 = vmatpush3.bf16.msra.mxu0 %v2617_v53 }
 0x50e   :  { %2300 = vmatprep.subr.bf16.mxu0 %v2618_v54 }
 0x511   :  { %2301 = vmatpush3.bf16.msra.mxu0 %v2619_v55 }
 0x512   :  { %2302 = vmatprep.subr.bf16.mxu0 %v2620_v56 }
 0x515   :  { %2303 = vmatpush3.bf16.msra.mxu0 %v2621_v57 }
 0x516   :  { %2304 = vmatprep.subr.bf16.mxu0 %v2622_v58 }
 0x519   :  { %2305 = vmatpush3.bf16.msra.mxu0 %v2623_v59 }
 0x532   :  { %v1647_v62 = vpop.f32.mrb[16].mxu1 }
 0x533   :  { %v1648_v63 = vadd.f32 %v1647_v62, %v1243_v60  ;;  %v1649_v1 = vpop.f32.mrb[17].mxu1 }
 0x534   :  { %v1650_v2 = vadd.f32 %v1649_v1, %v1247_v61  ;;  %v1651_v3 = vpop.f32.mrb[18].mxu1 }
 0x535   :  { %vm1656_vm11 = vcmp.gt.f32.partialorder %v1648_v63, 0.0  ;;  %v1660_v4 = vmul.f32 0.2, %v1648_v63  ;;  %v1652_v5 = vpop.f32.mrb[19].mxu1 }
 0x536   :  { %vm1657_vm12 = vcmp.gt.f32.partialorder %v1650_v2, 0.0  ;;  %v1661_v6 = vmul.f32 0.2, %v1650_v2 }
 0x537   :  { %v1664_v8 = vsel %vm1656_vm11, %v1648_v63, %v1660_v4 }
 0x538   :  { %v1665_v9 = vsel %vm1657_vm12, %v1650_v2, %v1661_v6  ;;  %v1668_v11 = vpack.c.bf16 %v1664_v8, %v1664_v8 }
 0x539   :  { %v1669_v10 = vpack.c.bf16 %v1665_v9, %v1665_v9 }
 0x53b   :  { %2005 = vmatprep.mubr.bf16.mxu0 %v1669_v10 }
 0x53c   :  { %2006 = vmatmul.mubr.bf16.vlgmr.msra.gmra.mrb[12].mxu0 %v1668_v11 }
 0x5cf   :  { %v2284_v7 = vpop.f32.mrb[8].mxu0 }
 0x5d0   :  { %v2285_v12 = vpop.f32.mrb[9].mxu0 }
 0x5d1   :  { %v2286_v18 = vadd.f32 %v2285_v12, %v2284_v7  ;;  %v2287_v33 = vpop.f32.mrb[10].mxu0 }
 0x5d2   :  { %v2288_v13 = vpop.f32.mrb[11].mxu0 }
 0x5d3   :  { %v1968_v17 = vadd.f32 %v2286_v18, %v2213_v14 }
 0x60f   :  { %v2306_v15 = vpop.f32.mrb[12].mxu0 }
 0x610   :  { %v2307_v16 = vpop.f32.mrb[13].mxu0 }
 0x611   :  { %v2308_v22 = vadd.f32 %v2307_v16, %v2306_v15  ;;  %v2309_v23 = vpop.f32.mrb[14].mxu0 }
 0x612   :  { %v2310_v20 = vpop.f32.mrb[15].mxu0 }
 0x613   :  { %v2008_v24 = vadd.f32 %v2308_v22, %v1968_v17 }
 0x615   :  { %2013 = vst [vmem:[#allocation10] sm:$0xff] %v2008_v24 }
 0x616   :  { %2723 = shalt.err (!%p2720_p8)
}
 0x617   :  { %s2724_s30 = scalar_lea.hbm %s3024_s13, 128 }
 0x618   :  { %p2725_p9 = scmp.ne.s32.totalorder %s3024_s13, %s2724_s30  ;;  %p2728_p10 = scmp.lt.u32.totalorder %s2724_s30, %s3024_s13 }
 0x61a   :  { %p2730_p11 = pnand %p2728_p10, %p2725_p9 }
 0x61c   :  { %2733 = shalt.err (!%p2730_p11)
}
 0x61d   :  { %2023 = dma.vmem_to_hbm [thread:$0]  %s2021_s28, 128, %s3024_s13, [#allocation4]  }
 0x61e   :  { %2740 = dma.done.wait [#allocation4], 128  }
 0x61f   :  { %2741 = vsyncadd [#allocation4], 4294967168 }
 0x620   :  { %2027 = vsyncpa [#allocation3], 1 }
 0x621   :  { %2028 = vsyncpa [#allocation6], 1 }
 0x622   :  { %2029 = vsyncpa [#allocation9], 1 }
 0x623   :  { %2030 = vsyncpa [#allocation4], 1 }

</bundles_post_ra>
